<compile_context>
chip_gen: v6e
topology: v6e:2x2x1
jax: 0.10.0
libtpu: 0.0.40
codegen_flags: <defaults>
</compile_context>

<pallas_src>
import jax
import jax.numpy as jnp
from jax.experimental import pallas as pl
from jax.experimental.pallas import tpu as pltpu

B_TOTAL = 256        # total batch rows (demo size)
D_IN = 128           # input features   (lane-aligned)
D_OUT = 128          # output features  (lane-aligned)
NUM_BRANCHES = 2
N_CAT = (1 + NUM_BRANCHES) * D_OUT   # 384 = main + 2 branches, packed on lanes


def _num_tensorcores() -> int:
    """Grid steps to emit: 2 on v7x (two TensorCores/chip), 1 on v5e/v6e."""
    try:
        kind = jax.devices()[0].device_kind.lower()
    except Exception:
        return 1
    return 2 if "v7" in kind else 1


def minibranch_kernel(x_ref, wcat_ref, bcat_ref, o_ref):
    """Fused (main + branches) matmul + bias + ReLU + merge for one batch tile.

    x_ref    : (TB, D_IN)      VMEM bf16/f32 activation tile
    wcat_ref : (D_IN, N_CAT)   VMEM bf16     packed [Wm | Wb0/2 | Wb1/2]
    bcat_ref : (1, N_CAT)      VMEM f32      packed [bm | bb0/2 | bb1/2]
    o_ref    : (TB, D_OUT)     VMEM bf16     merged output tile
    """
    # Single MXU pass over the packed weights, bf16 inputs, f32 accumulation.
    # astype is a no-op when the producer already emits bf16 activations.
    x = x_ref[...].astype(jnp.bfloat16)
    y = jnp.dot(x, wcat_ref[...], preferred_element_type=jnp.float32)

    # One bias add + ReLU epilogue in f32 over the whole (TB, 384) result.
    y = jnp.maximum(y + bcat_ref[...], 0.0)

    # Slices land on exact 128-lane vreg boundaries -> free.
    # 1/NUM_BRANCHES is already folded into the branch weights/biases, so the
    # merge is a pure add: main + sum(scaled branches) == main + mean(branches).
    main = y[:, 0:D_OUT]
    merged = main + y[:, D_OUT:2 * D_OUT] + y[:, 2 * D_OUT:3 * D_OUT]

    o_ref[...] = merged.astype(o_ref.dtype)


def pack_params(wm, bm, wb, bb):
    """Pack the three Linear layers once, outside the per-call path.

    Folds the 1/NUM_BRANCHES merge scale into the branch weights/biases
    (exact: ReLU is positively homogeneous and 0.5 is a binary scale).
    """
    scale = 1.0 / NUM_BRANCHES
    w_cat = jnp.concatenate(
        [wm] + [wb[i] * scale for i in range(NUM_BRANCHES)],
        axis=1).astype(jnp.bfloat16)                         # (D_IN, 384) bf16
    b_cat = jnp.concatenate(
        [bm] + [bb[i] * scale for i in range(NUM_BRANCHES)],
        axis=1).astype(jnp.float32)                          # (1, 384) f32
    return w_cat, b_cat


def minibranch_forward(x, w_cat, b_cat, *, out_dtype=jnp.bfloat16):
    """x: (B, D_IN) bf16 (or f32); w_cat: (D_IN, N_CAT) bf16; b_cat: (1, N_CAT) f32."""
    B = x.shape[0]
    grid_steps = _num_tensorcores()          # 1 on v5e/v6e, 2 on v7x
    assert B % grid_steps == 0, "batch must split evenly across TensorCores"
    tb = B // grid_steps
    assert tb % 8 == 0, "batch tile must be sublane-aligned (multiple of 8)"

    out_itemsize = jnp.dtype(out_dtype).itemsize
    flops = 2 * B * D_IN * N_CAT
    bytes_accessed = (x.size * x.dtype.itemsize          # activations in
                      + w_cat.size * 2                   # bf16 weights
                      + b_cat.size * 4                   # f32 bias
                      + B * D_OUT * out_itemsize)        # output writeback

    return pl.pallas_call(
        minibranch_kernel,
        out_shape=jax.ShapeDtypeStruct((B, D_OUT), out_dtype),
        grid_spec=pltpu.PrefetchScalarGridSpec(
            num_scalar_prefetch=0,
            grid=(grid_steps,),
            in_specs=[
                # Activation tile marches over the batch; auto double-buffered.
                pl.BlockSpec((tb, D_IN), lambda i: (i, 0)),
                # Packed weights / bias: constant block -> DMA'd once,
                # VMEM-resident across all grid steps.
                pl.BlockSpec((D_IN, N_CAT), lambda i: (0, 0)),
                pl.BlockSpec((1, N_CAT), lambda i: (0, 0)),
            ],
            out_specs=pl.BlockSpec((tb, D_OUT), lambda i: (i, 0)),
        ),
        compiler_params=pltpu.CompilerParams(
            dimension_semantics=("parallel",)),
        cost_estimate=pl.CostEstimate(flops=flops, transcendentals=0,
                                      bytes_accessed=bytes_accessed),
    )(x, w_cat, b_cat)


def reference_forward(x, wm, bm, wb, bb):
    """Pure-JAX reference with the same bf16-matmul / f32-accumulate numerics."""
    xb = x.astype(jnp.bfloat16)

    def linear_relu(w, b):
        y = jnp.dot(xb, w.astype(jnp.bfloat16),
                    preferred_element_type=jnp.float32)
        return jnp.maximum(y + b.astype(jnp.float32), 0.0)

    main = linear_relu(wm, bm)
    branches = [linear_relu(wb[i], bb[i]) for i in range(NUM_BRANCHES)]
    return main + sum(branches) / NUM_BRANCHES


if __name__ == "__main__":
    key = jax.random.PRNGKey(0)
    kx, kwm, kbm, kwb, kbb = jax.random.split(key, 5)

    # Upstream producer emits bf16 activations (cast happens once at data
    # construction, NOT inside the forward path).
    x = jax.random.normal(kx, (B_TOTAL, D_IN),
                          dtype=jnp.float32).astype(jnp.bfloat16)
    wm = jax.random.normal(kwm, (D_IN, D_OUT), dtype=jnp.float32) * 0.05
    bm = jax.random.normal(kbm, (1, D_OUT), dtype=jnp.float32) * 0.05
    wb = jax.random.normal(kwb, (NUM_BRANCHES, D_IN, D_OUT),
                           dtype=jnp.float32) * 0.05
    bb = jax.random.normal(kbb, (NUM_BRANCHES, 1, D_OUT),
                           dtype=jnp.float32) * 0.05

    # Pack once at init time (hoisted out of the per-call path).
    w_cat, b_cat = jax.block_until_ready(pack_params(wm, bm, wb, bb))

    out = jax.block_until_ready(
        minibranch_forward(x, w_cat, b_cat, out_dtype=jnp.bfloat16))

    ref = reference_forward(x, wm, bm, wb, bb)
    assert out.shape == (B_TOTAL, D_OUT)
    assert jnp.allclose(out.astype(jnp.float32), ref, atol=2e-2, rtol=2e-2), \
        "mismatch vs reference"

    print("KERNEL_OK")
</pallas_src>

<mosaic_0001>
module attributes {stable_mosaic.version = 11 : i64} {
  func.func @minibranch_kernel(%arg0: i32, %arg1: memref<256x128xbf16, #tpu.memory_space<vmem>>, %arg2: memref<128x384xbf16, #tpu.memory_space<vmem>>, %arg3: memref<1x384xf32, #tpu.memory_space<vmem>>, %arg4: memref<256x128xbf16, #tpu.memory_space<vmem>>) attributes {dimension_semantics = [#tpu.dimension_semantics<parallel>], iteration_bounds = array<i64: 1>, scalar_prefetch = 0 : i64, scratch_operands = 0 : i64, tpu.core_type = #tpu.core_type<tc>, window_params = [{transform_indices = @transform_0, window_bounds = array<i64: 256, 128>}, {pipeline_mode = #tpu.pipeline_mode<synchronous>, transform_indices = @transform_1, window_bounds = array<i64: 128, 384>}, {pipeline_mode = #tpu.pipeline_mode<synchronous>, transform_indices = @transform_2, window_bounds = array<i64: 1, 384>}, {transform_indices = @transform_3, window_bounds = array<i64: 256, 128>}]} {
    %c0 = arith.constant 0 : index
    %c0_0 = arith.constant 0 : index
    %0 = vector.load %arg1[%c0, %c0_0] : memref<256x128xbf16, #tpu.memory_space<vmem>>, vector<256x128xbf16>
    %c0_1 = arith.constant 0 : index
    %c0_2 = arith.constant 0 : index
    %1 = vector.load %arg2[%c0_1, %c0_2] : memref<128x384xbf16, #tpu.memory_space<vmem>>, vector<128x384xbf16>
    %cst = arith.constant dense<0.000000e+00> : vector<256x384xf32>
    %2 = tpu.matmul %0, %1, %cst {dimension_numbers = #tpu.dot_dimension_numbers<[1], [0], [0], [1], [0, 0, 1, 1], [], []>} : vector<256x128xbf16>, vector<128x384xbf16>, vector<256x384xf32> -> vector<256x384xf32>
    %c0_3 = arith.constant 0 : index
    %c0_4 = arith.constant 0 : index
    %3 = vector.load %arg3[%c0_3, %c0_4] : memref<1x384xf32, #tpu.memory_space<vmem>>, vector<1x384xf32>
    %4 = vector.broadcast %3 : vector<1x384xf32> to vector<256x384xf32>
    %5 = arith.addf %2, %4 : vector<256x384xf32>
    %cst_5 = arith.constant 0.000000e+00 : f32
    %6 = vector.broadcast %cst_5 : f32 to vector<256x384xf32>
    %7 = arith.maximumf %5, %6 : vector<256x384xf32>
    %8 = vector.extract_strided_slice %7 {offsets = [0, 0], sizes = [256, 128], strides = [1, 1]} : vector<256x384xf32> to vector<256x128xf32>
    %9 = vector.extract_strided_slice %7 {offsets = [0, 128], sizes = [256, 128], strides = [1, 1]} : vector<256x384xf32> to vector<256x128xf32>
    %10 = arith.addf %8, %9 : vector<256x128xf32>
    %11 = vector.extract_strided_slice %7 {offsets = [0, 256], sizes = [256, 128], strides = [1, 1]} : vector<256x384xf32> to vector<256x128xf32>
    %12 = arith.addf %10, %11 : vector<256x128xf32>
    %13 = arith.truncf %12 : vector<256x128xf32> to vector<256x128xbf16>
    %c0_6 = arith.constant 0 : index
    %c0_7 = arith.constant 0 : index
    %14 = vector.load %arg4[%c0_6, %c0_7] : memref<256x128xbf16, #tpu.memory_space<vmem>>, vector<256x128xbf16>
    tpu.vector_store %arg4[%c0_6, %c0_7], %13 {strides = array<i32>} : memref<256x128xbf16, #tpu.memory_space<vmem>>, vector<256x128xbf16>,
    return
  }
  func.func @transform_0(%arg0: i32) -> (i32, i32) {
    %c0_i32 = arith.constant 0 : i32
    %c0_i32_0 = arith.constant 0 : i32
    return %arg0, %c0_i32 : i32, i32
  }
  func.func @transform_1(%arg0: i32) -> (i32, i32) {
    %c0_i32 = arith.constant 0 : i32
    %c0_i32_0 = arith.constant 0 : i32
    %c0_i32_1 = arith.constant 0 : i32
    return %c0_i32, %c0_i32_0 : i32, i32
  }
  func.func @transform_2(%arg0: i32) -> (i32, i32) {
    %c0_i32 = arith.constant 0 : i32
    %c0_i32_0 = arith.constant 0 : i32
    %c0_i32_1 = arith.constant 0 : i32
    return %c0_i32, %c0_i32_0 : i32, i32
  }
  func.func @transform_3(%arg0: i32) -> (i32, i32) {
    %c0_i32 = arith.constant 0 : i32
    %c0_i32_0 = arith.constant 0 : i32
    return %arg0, %c0_i32 : i32, i32
  }
}

</mosaic_0001>

<bundles_post_ra>
// kernel: tpu_custom_call.1
= control target key start
LH: loop header
LB: loop body
LE: loop exit
PB: predicated region body
PF: predicated region fallthrough
CT: control target
= control target key end

     0   :  { %8 = vsyncpa [#allocation3], 0  ;;  %s1689_s0 = inlined_call_operand.hbm [shape: bf16[256,128], index: 0, kind: input, shape index: {}]   ;;  %s1690_s1 = inlined_call_operand.hbm [shape: bf16[128,384], index: 1, kind: input, shape index: {}]   ;;  %s1691_s2 = inlined_call_operand.vmem [shape: f32[1,384], index: 2, kind: input, shape index: {}]   ;;  %s1692_s3 = inlined_call_operand.hbm [shape: bf16[256,128], index: 3, kind: output, shape index: {}]  }
   0x1   :  { %9 = vsyncpa [#allocation6], 0 }
   0x2   :  { %10 = vsyncpa [#allocation4], 0  ;;  %s1450_s12 = smov [#allocation2]  }
   0x3   :  { %s16_s13 = sshll.u32 %s1450_s12, 4  ;;  %s17_s13 = int_to_ptr.vmem [resolvable:$true] %s16_s13 }
   0x4   :  { %s1392_s14 = scalar_lea.vmem %s17_s13, 2048  ;;  %p1397_p1 = scmp.lt.s32.totalorder %s17_s13, %s17_s13 }
   0x5   :  { %p1393_p0 = scmp.ne.s32.totalorder %s17_s13, %s1392_s14  ;;  %p1398_p2 = scmp.lt.s32.totalorder %s1392_s14, %s1392_s14 }
   0x7   :  { %p1399_p3 = por %p1398_p2, %p1397_p1 }
   0x9   :  { %p1400_p4 = pnand %p1399_p3, %p1393_p0 }
   0xb   :  { %1403 = shalt.err (!%p1400_p4)
}
   0xc   :  { %s1451_s15 = smov 64   ;;  %s1452_s16 = smov 4  }
   0xd   :  { %22 = dma.hbm_to_vmem [thread:$0]  %s1689_s0, 2048, %s17_s13, [#allocation3], %s1451_s15, %s1451_s15, %s1452_s16  }
   0xe   :  { %s1453_s19 = smov [#allocation5]  }
   0xf   :  { %s28_s20 = sshll.u32 %s1453_s19, 4  ;;  %s29_s20 = int_to_ptr.vmem [resolvable:$true] %s28_s20 }
  0x10   :  { %s1412_s21 = scalar_lea.vmem %s29_s20, 3072  ;;  %p1417_p6 = scmp.lt.s32.totalorder %s29_s20, %s29_s20 }
  0x11   :  { %p1413_p5 = scmp.ne.s32.totalorder %s29_s20, %s1412_s21  ;;  %p1418_p7 = scmp.lt.s32.totalorder %s1412_s21, %s1412_s21 }
  0x13   :  { %p1419_p8 = por %p1418_p7, %p1417_p6 }
  0x15   :  { %p1420_p9 = pnand %p1419_p8, %p1413_p5 }
  0x17   :  { %1423 = shalt.err (!%p1420_p9)
}
  0x18   :  { %s1454_s22 = smov 192   ;;  %s1455_s23 = smov 12  }
  0x19   :  { %34 = dma.hbm_to_vmem [thread:$0]  %s1690_s1, 3072, %s29_s20, [#allocation6], %s1454_s22, %s1454_s22, %s1455_s23  }
  0x1a   :  { %1444 = dma.done.wait [#allocation3], 2048  }
  0x1b   :  { %1445 = vsyncadd [#allocation3], 4294965248 }
  0x1c   :  { %1446 = dma.done.wait [#allocation6], 3072  }
  0x1d   :  { %1447 = vsyncadd [#allocation6], 4294964224  ;;  %v1456_v0 = vmov 0   ;;  %v1336_v1 = vld [vmem:[#allocation5 + $0xac] ss:$12 sps:$4 sm:$0xff]   ;;  %v1360_v18 = vld [vmem:[#allocation2] sm:$0xff]   ;;  %v110_v41 = vlaneseq }
  0x1e   :  { %381 = vmatprep.mubr.bf16.mxu0 %v1456_v0  ;;  %501 = vmatprep.mubr.bf16.mxu1 %v1456_v0  ;;  %v1338_v2 = vld [vmem:[#allocation5 + $0xa8] ss:$12 sps:$4 sm:$0xff]   ;;  %v1341_v4 = vld [vmem:[#allocation5 + $0x90] ss:$12 sps:$4 sm:$0xff]   ;;  %v1344_v6 = vld [vmem:[#allocation5 + $0x78] ss:$12 sps:$4 sm:$0xff]  }
  0x1f   :  { %349 = vmatprep.subr.bf16.mxu0 %v1336_v1  ;;  %1312 = vmatprep.subr.bf16.mxu1 %v1336_v1  ;;  %v1339_v3 = vld [vmem:[#allocation5 + $0x94] ss:$12 sps:$4 sm:$0xff]   ;;  %v1342_v5 = vld [vmem:[#allocation5 + $0x7c] ss:$12 sps:$4 sm:$0xff]   ;;  %v1345_v7 = vld [vmem:[#allocation5 + $0x64] ss:$12 sps:$4 sm:$0xff]  }
  0x20   :  { %350 = vmatpush1.bf16.msra.mxu0 %v1338_v2  ;;  %1320 = vmatpush1.bf16.msra.mxu1 %v1338_v2  ;;  %v1347_v8 = vld [vmem:[#allocation5 + $0x60] ss:$12 sps:$4 sm:$0xff]   ;;  %v1350_v10 = vld [vmem:[#allocation5 + $0x48] ss:$12 sps:$4 sm:$0xff]   ;;  %v1353_v12 = vld [vmem:[#allocation5 + $0x30] ss:$12 sps:$4 sm:$0xff]  }
  0x21   :  { %351 = vmatprep.subr.bf16.mxu0 %v1339_v3  ;;  %1313 = vmatprep.subr.bf16.mxu1 %v1339_v3  ;;  %v1348_v9 = vld [vmem:[#allocation5 + $0x4c] ss:$12 sps:$4 sm:$0xff]   ;;  %v1351_v11 = vld [vmem:[#allocation5 + $0x34] ss:$12 sps:$4 sm:$0xff]   ;;  %v1354_v13 = vld [vmem:[#allocation5 + $0x1c] ss:$12 sps:$4 sm:$0xff]  }
  0x22   :  { %v1356_v14 = vld [vmem:[#allocation5 + $0x18] ss:$12 sps:$4 sm:$0xff]   ;;  %v1359_v16 = vld [vmem:[#allocation5] ss:$12 sps:$4 sm:$0xff]   ;;  %v1362_v17 = vld [vmem:[#allocation5 + $0xb0] ss:$12 sps:$4 sm:$0xff]  }
  0x23   :  { %v1357_v15 = vld [vmem:[#allocation5 + $0x4] ss:$12 sps:$4 sm:$0xff]   ;;  %v1366_v21 = vld [vmem:[#allocation5 + $0x80] ss:$12 sps:$4 sm:$0xff]   ;;  %v1367_v24 = vld [vmem:[#allocation5 + $0x68] ss:$12 sps:$4 sm:$0xff]  }
  0x24   :  { %352 = vmatpush1.bf16.msra.mxu0 %v1341_v4  ;;  %1321 = vmatpush1.bf16.msra.mxu1 %v1341_v4  ;;  %v1489_v19 = vld [vmem:[#allocation2 + $0x60] sm:$0xff]   ;;  %v1364_v22 = vld [vmem:[#allocation2 + $0x8] sm:$0xff]   ;;  %v1370_v25 = vld [vmem:[#allocation5 + $0x50] ss:$12 sps:$4 sm:$0xff]   ;;  %v1511_v42 = vshrl.u32 %v110_v41, 7 }
  0x25   :  { %353 = vmatprep.subr.bf16.mxu0 %v1342_v5  ;;  %1314 = vmatprep.subr.bf16.mxu1 %v1342_v5  ;;  %v1363_v20 = vld [vmem:[#allocation5 + $0x98] ss:$12 sps:$4 sm:$0xff]   ;;  %v1494_v23 = vld [vmem:[#allocation2 + $0x68] sm:$0xff]   ;;  %v1368_v26 = vld [vmem:[#allocation2 + $0x10] sm:$0xff]  }
  0x26   :  { %v1369_v27 = vld [vmem:[#allocation2 + $0x70] sm:$0xff]   ;;  %v1371_v28 = vld [vmem:[#allocation5 + $0x38] ss:$12 sps:$4 sm:$0xff]   ;;  %v1374_v29 = vld [vmem:[#allocation5 + $0x20] ss:$12 sps:$4 sm:$0xff]   ;;  %v112_v43 = vsub.s32 0, %v1511_v42 }
  0x27   :  { %v1372_v30 = vld [vmem:[#allocation2 + $0x18] sm:$0xff]   ;;  %v1375_v32 = vld [vmem:[#allocation5 + $0x8] ss:$12 sps:$4 sm:$0xff]   ;;  %v1376_v33 = vld [vmem:[#allocation2 + $0x20] sm:$0xff]   ;;  %v116_v44 = vsub.s32 1, %v1511_v42 }
  0x28   :  { %354 = vmatpush1.bf16.msra.mxu0 %v1344_v6  ;;  %1322 = vmatpush1.bf16.msra.mxu1 %v1344_v6  ;;  %v1373_v31 = vld [vmem:[#allocation2 + $0x78] sm:$0xff]   ;;  %v1377_v34 = vld [vmem:[#allocation2 + $0x28] sm:$0xff]   ;;  %v1378_v35 = vld [vmem:[#allocation2 + $0x30] sm:$0xff]  }
  0x29   :  { %355 = vmatprep.subr.bf16.mxu0 %v1345_v7  ;;  %1315 = vmatprep.subr.bf16.mxu1 %v1345_v7  ;;  %v1379_v36 = vld [vmem:[#allocation2 + $0x38] sm:$0xff]   ;;  %v1380_v37 = vld [vmem:[#allocation2 + $0x40] sm:$0xff]   ;;  %v1381_v38 = vld [vmem:[#allocation2 + $0x48] sm:$0xff]  }
  0x2a   :  { %v1382_v39 = vld [vmem:[#allocation2 + $0x50] sm:$0xff]   ;;  %v1383_v40 = vld [vmem:[#allocation2 + $0x58] sm:$0xff]   ;;  %v1518_v45 = vld [vmem:[%s1691_s2] sm:$0x7]  ;;  %s1457_s2 = smov [#allocation7]  }
  0x2b   :  { %v1521_v46 = vrot.slane %v1518_v45, %v112_v43  ;;  %v1524_v47 = vrot.slane %v1518_v45, %v116_v44  ;;  %v120_v43 = vsub.s32 2, %v1511_v42  ;;  %s1028_s26 = sshll.u32 %s1457_s2, 4  ;;  %s1029_s26 = int_to_ptr.vmem [resolvable:$true] %s1028_s26 }
  0x2c   :  { %356 = vmatpush1.bf16.msra.mxu0 %v1347_v8  ;;  %1323 = vmatpush1.bf16.msra.mxu1 %v1347_v8  ;;  %s1424_s27 = scalar_lea.vmem %s1029_s26, 2048  ;;  %p1429_p11 = scmp.lt.s32.totalorder %s1029_s26, %s1029_s26 }
  0x2d   :  { %357 = vmatprep.subr.bf16.mxu0 %v1348_v9  ;;  %1316 = vmatprep.subr.bf16.mxu1 %v1348_v9  ;;  %v1569_v42 = vrot.slane %v1518_v45, %v120_v43  ;;  %p1425_p10 = scmp.ne.s32.totalorder %s1029_s26, %s1424_s27  ;;  %p1430_p12 = scmp.lt.s32.totalorder %s1424_s27, %s1424_s27 }
  0x2f   :  { %p1431_p13 = por %p1430_p12, %p1429_p11 }
  0x30   :  { %358 = vmatpush1.bf16.msra.mxu0 %v1350_v10  ;;  %1324 = vmatpush1.bf16.msra.mxu1 %v1350_v10 }
  0x31   :  { %359 = vmatprep.subr.bf16.mxu0 %v1351_v11  ;;  %1317 = vmatprep.subr.bf16.mxu1 %v1351_v11  ;;  %p1432_p0 = pnand %p1431_p13, %p1425_p10 }
  0x34   :  { %360 = vmatpush1.bf16.msra.mxu0 %v1353_v12  ;;  %1325 = vmatpush1.bf16.msra.mxu1 %v1353_v12 }
  0x35   :  { %361 = vmatprep.subr.bf16.mxu0 %v1354_v13  ;;  %1318 = vmatprep.subr.bf16.mxu1 %v1354_v13 }
  0x38   :  { %362 = vmatpush1.bf16.msra.mxu0 %v1356_v14  ;;  %1326 = vmatpush1.bf16.msra.mxu1 %v1356_v14 }
  0x39   :  { %363 = vmatprep.subr.bf16.mxu0 %v1357_v15  ;;  %1319 = vmatprep.subr.bf16.mxu1 %v1357_v15 }
  0x3c   :  { %364 = vmatpush1.bf16.msra.mxu0 %v1359_v16  ;;  %1327 = vmatpush1.bf16.msra.mxu1 %v1359_v16 }
  0x3d   :  { %1264 = vmatprep.subr.bf16.mxu1 %v1362_v17 }
  0x3f   :  { %382 = vmatmul.mubr.bf16.vlgmr.msra.gmra.mxu0 %v1360_v18  ;;  %502 = vmatmul.mubr.bf16.vlgmr.msra.gmra.mxu1 %v1489_v19 }
  0x40   :  { %1265 = vmatpush3.bf16.msra.mxu1 %v1362_v17  ;;  %391 = vmatprep.mubr.bf16.mxu0 %v1456_v0 }
  0x41   :  { %1266 = vmatprep.subr.bf16.mxu1 %v1363_v20  ;;  %511 = vmatprep.mubr.bf16.mxu1 %v1456_v0 }
  0x44   :  { %1267 = vmatpush3.bf16.msra.mxu1 %v1363_v20 }
  0x45   :  { %1268 = vmatprep.subr.bf16.mxu1 %v1366_v21 }
  0x47   :  { %392 = vmatmul.mubr.bf16.gmra.mxu0 %v1364_v22  ;;  %512 = vmatmul.mubr.bf16.gmra.mxu1 %v1494_v23 }
  0x48   :  { %1269 = vmatpush3.bf16.msra.mxu1 %v1366_v21  ;;  %401 = vmatprep.mubr.bf16.mxu0 %v1456_v0 }
  0x49   :  { %1270 = vmatprep.subr.bf16.mxu1 %v1367_v24  ;;  %521 = vmatprep.mubr.bf16.mxu1 %v1456_v0 }
  0x4c   :  { %1271 = vmatpush3.bf16.msra.mxu1 %v1367_v24 }
  0x4d   :  { %1272 = vmatprep.subr.bf16.mxu1 %v1370_v25 }
  0x4f   :  { %402 = vmatmul.mubr.bf16.gmra.mxu0 %v1368_v26  ;;  %522 = vmatmul.mubr.bf16.gmra.mxu1 %v1369_v27 }
  0x50   :  { %1273 = vmatpush3.bf16.msra.mxu1 %v1370_v25  ;;  %411 = vmatprep.mubr.bf16.mxu0 %v1456_v0 }
  0x51   :  { %1274 = vmatprep.subr.bf16.mxu1 %v1371_v28  ;;  %531 = vmatprep.mubr.bf16.mxu1 %v1456_v0 }
  0x54   :  { %1275 = vmatpush3.bf16.msra.mxu1 %v1371_v28 }
  0x55   :  { %1276 = vmatprep.subr.bf16.mxu1 %v1374_v29 }
  0x57   :  { %412 = vmatmul.mubr.bf16.gmra.mxu0 %v1372_v30  ;;  %532 = vmatmul.mubr.bf16.gmra.mxu1 %v1373_v31 }
  0x58   :  { %1277 = vmatpush3.bf16.msra.mxu1 %v1374_v29  ;;  %421 = vmatprep.mubr.bf16.mxu0 %v1456_v0 }
  0x59   :  { %1278 = vmatprep.subr.bf16.mxu1 %v1375_v32  ;;  %1280 = vmatprep.mubr.bf16.mxu1 %v1360_v18 }
  0x5c   :  { %1279 = vmatpush3.bf16.msra.mxu1 %v1375_v32 }
  0x5f   :  { %422 = vmatmul.mubr.bf16.gmra.mxu0 %v1376_v33  ;;  %1281 = vmatmul.mubr.bf16.vlgmr.msra.gmra.mxu1 %v1364_v22 }
  0x60   :  { %431 = vmatprep.mubr.bf16.mxu0 %v1456_v0  ;;  %1284 = vmatprep.mubr.bf16.mxu1 %v1368_v26 }
  0x67   :  { %432 = vmatmul.mubr.bf16.gmra.mxu0 %v1377_v34  ;;  %1285 = vmatmul.mubr.bf16.gmra.mxu1 %v1372_v30 }
  0x68   :  { %441 = vmatprep.mubr.bf16.mxu0 %v1456_v0  ;;  %1288 = vmatprep.mubr.bf16.mxu1 %v1376_v33 }
  0x6f   :  { %442 = vmatmul.mubr.bf16.gmra.mxu0 %v1378_v35  ;;  %1289 = vmatmul.mubr.bf16.gmra.mxu1 %v1377_v34 }
  0x70   :  { %451 = vmatprep.mubr.bf16.mxu0 %v1456_v0  ;;  %1292 = vmatprep.mubr.bf16.mxu1 %v1378_v35 }
  0x77   :  { %452 = vmatmul.mubr.bf16.gmra.mxu0 %v1379_v36  ;;  %1293 = vmatmul.mubr.bf16.gmra.mxu1 %v1379_v36 }
  0x78   :  { %461 = vmatprep.mubr.bf16.mxu0 %v1456_v0  ;;  %1296 = vmatprep.mubr.bf16.mxu1 %v1380_v37 }
  0x7f   :  { %462 = vmatmul.mubr.bf16.gmra.mxu0 %v1380_v37  ;;  %1297 = vmatmul.mubr.bf16.gmra.mxu1 %v1381_v38 }
  0x80   :  { %471 = vmatprep.mubr.bf16.mxu0 %v1456_v0  ;;  %1300 = vmatprep.mubr.bf16.mxu1 %v1382_v39 }
  0x87   :  { %472 = vmatmul.mubr.bf16.gmra.mxu0 %v1381_v38  ;;  %1301 = vmatmul.mubr.bf16.gmra.mxu1 %v1383_v40 }
  0x88   :  { %481 = vmatprep.mubr.bf16.mxu0 %v1456_v0  ;;  %1304 = vmatprep.mubr.bf16.mxu1 %v1489_v19 }
  0x8f   :  { %482 = vmatmul.mubr.bf16.gmra.mxu0 %v1382_v39  ;;  %1305 = vmatmul.mubr.bf16.gmra.mxu1 %v1494_v23 }
  0x90   :  { %491 = vmatprep.mubr.bf16.mxu0 %v1456_v0  ;;  %1308 = vmatprep.mubr.bf16.mxu1 %v1369_v27 }
  0x97   :  { %492 = vmatmul.mubr.bf16.gmra.mxu0 %v1383_v40  ;;  %1309 = vmatmul.mubr.bf16.gmra.mxu1 %v1373_v31 }
  0xff   :  { %v1526_v48 = vpop.f32.mrf.mxu0  ;;  %v503_v49 = vpop.f32.mrf.mxu1 }
 0x100   :  { %v504_v50 = vadd.f32 %v503_v49, %v1521_v46 }
 0x101   :  { %v385_v51 = vpop.f32.mrf.mxu0  ;;  %v505_v52 = vpop.f32.mrf.mxu1 }
 0x102   :  { %v775_v53 = vmax.f32 %v504_v50, 0.0  ;;  %v506_v54 = vadd.f32 %v505_v52, %v1524_v47 }
 0x103   :  { %v1530_v55 = vpop.f32.mrf.mxu0  ;;  %v507_v56 = vpop.f32.mrf.mxu1 }
 0x104   :  { %v776_v57 = vmax.f32 %v506_v54, 0.0  ;;  %v508_v58 = vadd.f32 %v507_v56, %v1521_v46  ;;  %v386_v54 = vadd.f32 %v385_v51, %v1524_v47 }
 0x105   :  { %v389_v59 = vpop.f32.mrf.mxu0  ;;  %v509_v60 = vpop.f32.mrf.mxu1 }
 0x106   :  { %v1533_v61 = vadd.f32 %v776_v57, %v775_v53  ;;  %v510_v62 = vadd.f32 %v509_v60, %v1524_v47  ;;  %v778_v2 = vmax.f32 %v508_v58, 0.0  ;;  %v390_v56 = vadd.f32 %v389_v59, %v1524_v47 }
 0x107   :  { %v393_v63 = vpop.f32.mrf.mxu0  ;;  %v513_v0 = vpop.f32.mrf.mxu1 }
 0x108   :  { %v514_v1 = vadd.f32 %v513_v0, %v1521_v46  ;;  %v779_v3 = vmax.f32 %v510_v62, 0.0  ;;  %v384_v0 = vadd.f32 %v1526_v48, %v1521_v46 }
 0x109   :  { %v395_v4 = vpop.f32.mrf.mxu0  ;;  %v515_v5 = vpop.f32.mrf.mxu1 }
 0x10a   :  { %v781_v6 = vmax.f32 %v514_v1, 0.0  ;;  %v516_v7 = vadd.f32 %v515_v5, %v1524_v47  ;;  %v1538_v8 = vadd.f32 %v779_v3, %v778_v2  ;;  %v396_v57 = vadd.f32 %v395_v4, %v1524_v47 }
 0x10b   :  { %v397_v9 = vpop.f32.mrf.mxu0  ;;  %v517_v10 = vpop.f32.mrf.mxu1  ;;  %v388_v1 = vadd.f32 %v1530_v55, %v1521_v46  ;;  %v394_v2 = vadd.f32 %v393_v63, %v1521_v46  ;;  %v704_v5 = vmax.f32 %v386_v54, 0.0 }
 0x10c   :  { %v782_v11 = vmax.f32 %v516_v7, 0.0  ;;  %v518_v12 = vadd.f32 %v517_v10, %v1521_v46  ;;  %v710_v7 = vmax.f32 %v396_v57, 0.0  ;;  %v398_v45 = vadd.f32 %v397_v9, %v1521_v46 }
 0x10d   :  { %v399_v13 = vpop.f32.mrf.mxu0  ;;  %v519_v14 = vpop.f32.mrf.mxu1  ;;  %v706_v55 = vmax.f32 %v388_v1, 0.0 }
 0x10e   :  { %v1541_v15 = vadd.f32 %v782_v11, %v781_v6  ;;  %v520_v16 = vadd.f32 %v519_v14, %v1524_v47  ;;  %v784_v20 = vmax.f32 %v518_v12, 0.0  ;;  %v400_v59 = vadd.f32 %v399_v13, %v1524_v47 }
 0x10f   :  { %v1544_v17 = vpop.f32.mrf.mxu0  ;;  %v523_v18 = vpop.f32.mrf.mxu1  ;;  %v707_v6 = vmax.f32 %v390_v56, 0.0  ;;  %v703_v12 = vmax.f32 %v384_v0, 0.0  ;;  %v709_v14 = vmax.f32 %v394_v2, 0.0 }
 0x110   :  { %v524_v19 = vadd.f32 %v523_v18, %v1521_v46  ;;  %v785_v21 = vmax.f32 %v520_v16, 0.0  ;;  %v713_v16 = vmax.f32 %v400_v59, 0.0  ;;  %v404_v9 = vadd.f32 %v1544_v17, %v1521_v46 }
 0x111   :  { %v405_v22 = vpop.f32.mrf.mxu0  ;;  %v525_v23 = vpop.f32.mrf.mxu1 }
 0x112   :  { %v787_v24 = vmax.f32 %v524_v19, 0.0  ;;  %v526_v25 = vadd.f32 %v525_v23, %v1524_v47  ;;  %v1548_v26 = vadd.f32 %v785_v21, %v784_v20  ;;  %v406_v63 = vadd.f32 %v405_v22, %v1524_v47 }
 0x113   :  { %v1550_v27 = vpop.f32.mrf.mxu0  ;;  %v527_v28 = vpop.f32.mrf.mxu1  ;;  %v799_v20 = vadd.f32 %v704_v5, %v703_v12  ;;  %v800_v21 = vadd.f32 %v707_v6, %v706_v55  ;;  %v801_v23 = vadd.f32 %v710_v7, %v709_v14 }
 0x114   :  { %v788_v29 = vmax.f32 %v526_v25, 0.0  ;;  %v528_v30 = vadd.f32 %v527_v28, %v1521_v46 }
 0x115   :  { %v409_v31 = vpop.f32.mrf.mxu0  ;;  %v529_v32 = vpop.f32.mrf.mxu1 }
 0x116   :  { %v1553_v33 = vadd.f32 %v788_v29, %v787_v24  ;;  %v530_v34 = vadd.f32 %v529_v32, %v1524_v47  ;;  %v790_v38 = vmax.f32 %v528_v30, 0.0  ;;  %v712_v24 = vmax.f32 %v398_v45, 0.0 }
 0x117   :  { %v413_v35 = vpop.f32.mrf.mxu0  ;;  %v533_v36 = vpop.f32.mrf.mxu1  ;;  %v716_v32 = vmax.f32 %v406_v63, 0.0 }
 0x118   :  { %v534_v37 = vadd.f32 %v533_v36, %v1521_v46  ;;  %v791_v39 = vmax.f32 %v530_v34, 0.0  ;;  %v410_v34 = vadd.f32 %v409_v31, %v1524_v47  ;;  %v414_v36 = vadd.f32 %v413_v35, %v1521_v46 }
 0x119   :  { %v415_v40 = vpop.f32.mrf.mxu0  ;;  %v535_v41 = vpop.f32.mrf.mxu1 }
 0x11a   :  { %v793_v44 = vmax.f32 %v534_v37, 0.0  ;;  %v536_v49 = vadd.f32 %v535_v41, %v1524_v47  ;;  %v1559_v50 = vadd.f32 %v791_v39, %v790_v38  ;;  %v416_v25 = vadd.f32 %v415_v40, %v1524_v47 }
 0x11b   :  { %v417_v52 = vpop.f32.mrf.mxu0  ;;  %v1561_v53 = vpop.f32.mrf.mxu1  ;;  %v802_v38 = vadd.f32 %v713_v16, %v712_v24  ;;  %v715_v40 = vmax.f32 %v404_v9, 0.0  ;;  %v719_v2 = vmax.f32 %v410_v34, 0.0  ;;  %v721_v59 = vmax.f32 %v414_v36, 0.0 }
 0x11c   :  { %v794_v58 = vmax.f32 %v536_v49, 0.0  ;;  %v408_v49 = vadd.f32 %v1550_v27, %v1521_v46  ;;  %v418_v54 = vadd.f32 %v417_v52, %v1521_v46  ;;  %v722_v31 = vmax.f32 %v416_v25, 0.0 }
 0x11d   :  { %v419_v60 = vpop.f32.mrf.mxu0  ;;  %v1566_v62 = vpop.f32.mrf.mxu1  ;;  %v803_v1 = vadd.f32 %v716_v32, %v715_v40 }
 0x11e   :  { %v1576_v51 = vadd.f32 %v794_v58, %v793_v44  ;;  %v420_v37 = vadd.f32 %v419_v60, %v1524_v47  ;;  %v718_v52 = vmax.f32 %v408_v49, 0.0  ;;  %v805_v14 = vadd.f32 %v722_v31, %v721_v59 }
 0x11f   :  { %v1579_v3 = vpop.f32.mrf.mxu0  ;;  %v1282_v4 = vpop.f32.mrf.mxu1 }
 0x120   :  { %v585_v10 = vadd.f32 %v1282_v4, %v1569_v42  ;;  %v725_v4 = vmax.f32 %v420_v37, 0.0  ;;  %v804_v25 = vadd.f32 %v719_v2, %v718_v52 }
 0x121   :  { %v425_v48 = vpop.f32.mrf.mxu0  ;;  %v576_v11 = vpop.f32.mrf.mxu1 }
 0x122   :  { %v577_v13 = vadd.f32 %v576_v11, %v1569_v42  ;;  %v711_v28 = vmax.f32 %v585_v10, 0.0  ;;  %v724_v11 = vmax.f32 %v418_v54, 0.0  ;;  %v426_v63 = vadd.f32 %v425_v48, %v1524_v47 }
 0x123   :  { %v1585_v18 = vpop.f32.mrf.mxu0  ;;  %v1283_v19 = vpop.f32.mrf.mxu1 }
 0x124   :  { %v588_v29 = vadd.f32 %v1283_v19, %v1569_v42  ;;  %v705_v39 = vmax.f32 %v577_v13, 0.0  ;;  %v833_v57 = vadd.f32 %v801_v23, %v711_v28  ;;  %v806_v23 = vadd.f32 %v725_v4, %v724_v11 }
 0x125   :  { %v429_v30 = vpop.f32.mrf.mxu0  ;;  %v579_v22 = vpop.f32.mrf.mxu1  ;;  %v728_v40 = vmax.f32 %v426_v63, 0.0 }
 0x126   :  { %v714_v41 = vmax.f32 %v588_v29, 0.0  ;;  %v580_v17 = vadd.f32 %v579_v22, %v1569_v42  ;;  %v831_v5 = vadd.f32 %v799_v20, %v705_v39  ;;  %v428_v39 = vadd.f32 %v1585_v18, %v1521_v46 }
 0x127   :  { %v433_v43 = vpop.f32.mrf.mxu0  ;;  %v1286_v44 = vpop.f32.mrf.mxu1 }
 0x128   :  { %v601_v56 = vadd.f32 %v1286_v44, %v1569_v42  ;;  %v834_v35 = vadd.f32 %v802_v38, %v714_v41  ;;  %v708_v58 = vmax.f32 %v580_v17, 0.0  ;;  %v434_v28 = vadd.f32 %v433_v43, %v1521_v46 }
 0x129   :  { %v435_v60 = vpop.f32.mrf.mxu0  ;;  %v592_v0 = vpop.f32.mrf.mxu1  ;;  %v730_v4 = vmax.f32 %v428_v39, 0.0 }
 0x12a   :  { %v1153_v6 = vpack.c.bf16 %v834_v35, %v833_v57  ;;  %v832_v7 = vadd.f32 %v800_v21, %v708_v58  ;;  %v593_v45 = vadd.f32 %v592_v0, %v1569_v42  ;;  %v723_v12 = vmax.f32 %v601_v56, 0.0 }
 0x12b   :  { %v437_v27 = vpop.f32.mrf.mxu0  ;;  %v1287_v10 = vpop.f32.mrf.mxu1  ;;  %v436_v13 = vadd.f32 %v435_v60, %v1524_v47  ;;  %v430_v21 = vadd.f32 %v429_v30, %v1524_v47  ;;  %v424_v30 = vadd.f32 %v1579_v3, %v1521_v46  ;;  %v733_v31 = vmax.f32 %v434_v28, 0.0 }
 0x12c   :  { %v604_v55 = vadd.f32 %v1287_v10, %v1569_v42  ;;  %1225 = vst [vmem:[#allocation7 + $0x8] sm:$0xff] %v1153_v6   ;;  %v1148_v16 = vpack.c.bf16 %v832_v7, %v831_v5  ;;  %v717_v29 = vmax.f32 %v593_v45, 0.0  ;;  %v837_v34 = vadd.f32 %v805_v14, %v723_v12 }
 0x12d   :  { %v439_v19 = vpop.f32.mrf.mxu0  ;;  %v595_v20 = vpop.f32.mrf.mxu1  ;;  %v438_v36 = vadd.f32 %v437_v27, %v1521_v46  ;;  %v734_v41 = vmax.f32 %v436_v13, 0.0  ;;  %v731_v49 = vmax.f32 %v430_v21, 0.0  ;;  %v727_v59 = vmax.f32 %v424_v30, 0.0 }
 0x12e   :  { %v726_v9 = vmax.f32 %v604_v55, 0.0  ;;  %v440_v24 = vadd.f32 %v439_v19, %v1524_v47  ;;  %1149 = vst [vmem:[#allocation7] sm:$0xff] %v1148_v16   ;;  %v596_v22 = vadd.f32 %v595_v20, %v1569_v42  ;;  %v835_v57 = vadd.f32 %v803_v1, %v717_v29 }
 0x12f   :  { %v443_v48 = vpop.f32.mrf.mxu0  ;;  %v1290_v32 = vpop.f32.mrf.mxu1  ;;  %v736_v2 = vmax.f32 %v438_v36, 0.0  ;;  %v809_v5 = vadd.f32 %v734_v41, %v733_v31  ;;  %v807_v11 = vadd.f32 %v728_v40, %v727_v59  ;;  %v808_v12 = vadd.f32 %v731_v49, %v730_v4 }
 0x130   :  { %v838_v37 = vadd.f32 %v806_v23, %v726_v9  ;;  %v617_v38 = vadd.f32 %v1290_v32, %v1569_v42  ;;  %v720_v17 = vmax.f32 %v596_v22, 0.0  ;;  %v737_v56 = vmax.f32 %v440_v24, 0.0 }
 0x131   :  { %v445_v43 = vpop.f32.mrf.mxu0  ;;  %v608_v44 = vpop.f32.mrf.mxu1  ;;  %v444_v13 = vadd.f32 %v443_v48, %v1521_v46 }
 0x132   :  { %v1163_v54 = vpack.c.bf16 %v838_v37, %v837_v34  ;;  %v836_v35 = vadd.f32 %v804_v25, %v720_v17  ;;  %v609_v58 = vadd.f32 %v608_v44, %v1569_v42  ;;  %v735_v3 = vmax.f32 %v617_v38, 0.0 }
 0x133   :  { %v447_v60 = vpop.f32.mrf.mxu0  ;;  %v1291_v0 = vpop.f32.mrf.mxu1  ;;  %v810_v27 = vadd.f32 %v737_v56, %v736_v2  ;;  %v446_v55 = vadd.f32 %v445_v43, %v1524_v47  ;;  %v739_v30 = vmax.f32 %v444_v13, 0.0 }
 0x134   :  { %1227 = vst [vmem:[#allocation7 + $0x18] sm:$0xff] %v1163_v54   ;;  %v620_v18 = vadd.f32 %v1291_v0, %v1569_v42  ;;  %v1158_v6 = vpack.c.bf16 %v836_v35, %v835_v57  ;;  %v729_v10 = vmax.f32 %v609_v58, 0.0  ;;  %v841_v19 = vadd.f32 %v809_v5, %v735_v3 }
 0x135   :  { %v449_v7 = vpop.f32.mrf.mxu0  ;;  %v611_v45 = vpop.f32.mrf.mxu1  ;;  %v448_v21 = vadd.f32 %v447_v60, %v1521_v46  ;;  %v740_v32 = vmax.f32 %v446_v55, 0.0 }
 0x136   :  { %v738_v52 = vmax.f32 %v620_v18, 0.0  ;;  %v612_v1 = vadd.f32 %v611_v45, %v1569_v42  ;;  %1226 = vst [vmem:[#allocation7 + $0x10] sm:$0xff] %v1158_v6   ;;  %v450_v14 = vadd.f32 %v449_v7, %v1524_v47  ;;  %v839_v25 = vadd.f32 %v807_v11, %v729_v10 }
 0x137   :  { %v453_v63 = vpop.f32.mrf.mxu0  ;;  %v1294_v16 = vpop.f32.mrf.mxu1  ;;  %v742_v17 = vmax.f32 %v448_v21, 0.0  ;;  %v811_v58 = vadd.f32 %v740_v32, %v739_v30 }
 0x138   :  { %v842_v20 = vadd.f32 %v810_v27, %v738_v52  ;;  %v732_v23 = vmax.f32 %v612_v1, 0.0  ;;  %v454_v22 = vadd.f32 %v453_v63, %v1521_v46  ;;  %v743_v34 = vmax.f32 %v450_v14, 0.0 }
 0x139   :  { %v455_v9 = vpop.f32.mrf.mxu0  ;;  %v624_v24 = vpop.f32.mrf.mxu1  ;;  %v633_v43 = vadd.f32 %v1294_v16, %v1569_v42 }
 0x13a   :  { %v1173_v28 = vpack.c.bf16 %v842_v20, %v841_v19  ;;  %v840_v29 = vadd.f32 %v808_v12, %v732_v23  ;;  %v456_v36 = vadd.f32 %v455_v9, %v1524_v47  ;;  %v625_v37 = vadd.f32 %v624_v24, %v1569_v42 }
 0x13b   :  { %v457_v38 = vpop.f32.mrf.mxu0  ;;  %v1295_v48 = vpop.f32.mrf.mxu1  ;;  %v745_v56 = vmax.f32 %v454_v22, 0.0  ;;  %v812_v60 = vadd.f32 %v743_v34, %v742_v17  ;;  %v747_v5 = vmax.f32 %v633_v43, 0.0 }
 0x13c   :  { %1229 = vst [vmem:[#allocation7 + $0x28] sm:$0xff] %v1173_v28   ;;  %v1168_v39 = vpack.c.bf16 %v840_v29, %v839_v25  ;;  %v458_v41 = vadd.f32 %v457_v38, %v1521_v46  ;;  %v746_v44 = vmax.f32 %v456_v36, 0.0  ;;  %v636_v40 = vadd.f32 %v1295_v48, %v1569_v42 }
 0x13d   :  { %v459_v49 = vpop.f32.mrf.mxu0  ;;  %v627_v54 = vpop.f32.mrf.mxu1  ;;  %v741_v31 = vmax.f32 %v625_v37, 0.0 }
 0x13e   :  { %1228 = vst [vmem:[#allocation7 + $0x20] sm:$0xff] %v1168_v39   ;;  %v460_v57 = vadd.f32 %v459_v49, %v1524_v47  ;;  %v628_v35 = vadd.f32 %v627_v54, %v1569_v42  ;;  %v813_v3 = vadd.f32 %v746_v44, %v745_v56  ;;  %v748_v18 = vmax.f32 %v458_v41, 0.0 }
 0x13f   :  { %v463_v0 = vpop.f32.mrf.mxu0  ;;  %v1298_v2 = vpop.f32.mrf.mxu1  ;;  %v750_v6 = vmax.f32 %v636_v40, 0.0  ;;  %v843_v27 = vadd.f32 %v811_v58, %v741_v31 }
 0x140   :  { %v749_v59 = vmax.f32 %v460_v57, 0.0  ;;  %v744_v4 = vmax.f32 %v628_v35, 0.0  ;;  %v464_v1 = vadd.f32 %v463_v0, %v1521_v46  ;;  %v845_v14 = vadd.f32 %v813_v3, %v747_v5 }
 0x141   :  { %v465_v7 = vpop.f32.mrf.mxu0  ;;  %v640_v45 = vpop.f32.mrf.mxu1  ;;  %v649_v58 = vadd.f32 %v1298_v2, %v1569_v42  ;;  %v1651_v2 = vadd.f32 %v1566_v62, %v1524_v47 }
 0x142   :  { %v814_v10 = vadd.f32 %v749_v59, %v748_v18  ;;  %v844_v52 = vadd.f32 %v812_v60, %v744_v4  ;;  %v466_v11 = vadd.f32 %v465_v7, %v1524_v47  ;;  %v751_v9 = vmax.f32 %v464_v1, 0.0 }
 0x143   :  { %v467_v12 = vpop.f32.mrf.mxu0  ;;  %v1299_v55 = vpop.f32.mrf.mxu1  ;;  %v641_v24 = vadd.f32 %v640_v45, %v1569_v42  ;;  %v1646_v4 = vadd.f32 %v1561_v53, %v1521_v46 }
 0x144   :  { %v846_v63 = vadd.f32 %v814_v10, %v750_v6  ;;  %v1178_v16 = vpack.c.bf16 %v844_v52, %v843_v27  ;;  %v468_v13 = vadd.f32 %v467_v12, %v1521_v46  ;;  %v752_v19 = vmax.f32 %v466_v11, 0.0 }
 0x145   :  { %v469_v20 = vpop.f32.mrf.mxu0  ;;  %v643_v23 = vpop.f32.mrf.mxu1  ;;  %v753_v48 = vmax.f32 %v641_v24, 0.0  ;;  %v652_v60 = vadd.f32 %v1299_v55, %v1569_v42  ;;  %v759_v11 = vmax.f32 %v649_v58, 0.0 }
 0x146   :  { %v1183_v21 = vpack.c.bf16 %v846_v63, %v845_v14  ;;  %1230 = vst [vmem:[#allocation7 + $0x30] sm:$0xff] %v1178_v16   ;;  %v470_v25 = vadd.f32 %v469_v20, %v1524_v47  ;;  %v644_v28 = vadd.f32 %v643_v23, %v1569_v42  ;;  %v815_v32 = vadd.f32 %v752_v19, %v751_v9 }
 0x147   :  { %v473_v29 = vpop.f32.mrf.mxu0  ;;  %v1634_v22 = vpop.f32.mrf.mxu1  ;;  %v754_v34 = vmax.f32 %v468_v13, 0.0  ;;  %v762_v12 = vmax.f32 %v652_v60, 0.0  ;;  %v796_v16 = vmax.f32 %v1646_v4, 0.0 }
 0x148   :  { %1231 = vst [vmem:[#allocation7 + $0x38] sm:$0xff] %v1183_v21   ;;  %v755_v36 = vmax.f32 %v470_v25, 0.0  ;;  %v756_v39 = vmax.f32 %v644_v28, 0.0  ;;  %v474_v17 = vadd.f32 %v473_v29, %v1521_v46  ;;  %v847_v40 = vadd.f32 %v815_v32, %v753_v48 }
 0x149   :  { %v475_v37 = vpop.f32.mrf.mxu0  ;;  %v656_v38 = vpop.f32.mrf.mxu1  ;;  %v797_v28 = vmax.f32 %v1651_v2, 0.0 }
 0x14a   :  { %v816_v30 = vadd.f32 %v755_v36, %v754_v34  ;;  %v476_v41 = vadd.f32 %v475_v37, %v1524_v47  ;;  %v757_v0 = vmax.f32 %v474_v17, 0.0  ;;  %v657_v13 = vadd.f32 %v656_v38, %v1569_v42 }
 0x14b   :  { %v477_v43 = vpop.f32.mrf.mxu0  ;;  %v1638_v44 = vpop.f32.mrf.mxu1 }
 0x14c   :  { %v848_v49 = vadd.f32 %v816_v30, %v756_v39  ;;  %v758_v54 = vmax.f32 %v476_v41, 0.0  ;;  %v478_v56 = vadd.f32 %v477_v43, %v1521_v46  ;;  %v765_v41 = vmax.f32 %v657_v13, 0.0 }
 0x14d   :  { %v479_v31 = vpop.f32.mrf.mxu0  ;;  %v659_v57 = vpop.f32.mrf.mxu1 }
 0x14e   :  { %v1188_v35 = vpack.c.bf16 %v848_v49, %v847_v40  ;;  %v480_v3 = vadd.f32 %v479_v31, %v1524_v47  ;;  %v817_v5 = vadd.f32 %v758_v54, %v757_v0  ;;  %v760_v6 = vmax.f32 %v478_v56, 0.0 }
 0x14f   :  { %v483_v18 = vpop.f32.mrf.mxu0  ;;  %v1306_v59 = vpop.f32.mrf.mxu1  ;;  %v660_v29 = vadd.f32 %v659_v57, %v1569_v42 }
 0x150   :  { %1232 = vst [vmem:[#allocation7 + $0x40] sm:$0xff] %v1188_v35   ;;  %v761_v7 = vmax.f32 %v480_v3, 0.0  ;;  %v681_v45 = vadd.f32 %v1306_v59, %v1569_v42  ;;  %v484_v52 = vadd.f32 %v483_v18, %v1521_v46  ;;  %v849_v62 = vadd.f32 %v817_v5, %v759_v11 }
 0x151   :  { %v485_v27 = vpop.f32.mrf.mxu0  ;;  %v672_v10 = vpop.f32.mrf.mxu1  ;;  %v768_v58 = vmax.f32 %v660_v29, 0.0 }
 0x152   :  { %v486_v1 = vadd.f32 %v485_v27, %v1524_v47  ;;  %v818_v53 = vadd.f32 %v761_v7, %v760_v6  ;;  %v673_v55 = vadd.f32 %v672_v10, %v1569_v42  ;;  %v783_v21 = vmax.f32 %v681_v45, 0.0 }
 0x153   :  { %v487_v14 = vpop.f32.mrf.mxu0  ;;  %v1307_v63 = vpop.f32.mrf.mxu1  ;;  %v763_v32 = vmax.f32 %v484_v52, 0.0  ;;  %v665_v10 = vadd.f32 %v1634_v22, %v1569_v42 }
 0x154   :  { %v764_v19 = vmax.f32 %v486_v1, 0.0  ;;  %v488_v20 = vadd.f32 %v487_v14, %v1521_v46  ;;  %v850_v23 = vadd.f32 %v818_v53, %v762_v12  ;;  %v684_v9 = vadd.f32 %v1307_v63, %v1569_v42 }
 0x155   :  { %v489_v24 = vpop.f32.mrf.mxu0  ;;  %v675_v25 = vpop.f32.mrf.mxu1  ;;  %v777_v37 = vmax.f32 %v673_v55, 0.0  ;;  %v857_v49 = vadd.f32 %v1541_v15, %v783_v21  ;;  %v830_v14 = vadd.f32 %v797_v28, %v796_v16 }
 0x156   :  { %v490_v34 = vadd.f32 %v489_v24, %v1524_v47  ;;  %v1193_v36 = vpack.c.bf16 %v850_v23, %v849_v62  ;;  %v786_v38 = vmax.f32 %v684_v9, 0.0  ;;  %v676_v48 = vadd.f32 %v675_v25, %v1569_v42 }
 0x157   :  { %v493_v30 = vpop.f32.mrf.mxu0  ;;  %v1310_v39 = vpop.f32.mrf.mxu1  ;;  %v819_v17 = vadd.f32 %v764_v19, %v763_v32  ;;  %v766_v43 = vmax.f32 %v488_v20, 0.0  ;;  %v855_v18 = vadd.f32 %v1533_v61, %v777_v37  ;;  %v771_v9 = vmax.f32 %v665_v10, 0.0 }
 0x158   :  { %v767_v40 = vmax.f32 %v490_v34, 0.0  ;;  %1233 = vst [vmem:[#allocation7 + $0x48] sm:$0xff] %v1193_v36   ;;  %v858_v54 = vadd.f32 %v1548_v26, %v786_v38  ;;  %v780_v56 = vmax.f32 %v676_v48, 0.0  ;;  %v697_v31 = vadd.f32 %v1310_v39, %v1569_v42 }
 0x159   :  { %v495_v57 = vpop.f32.mrf.mxu0  ;;  %v688_v35 = vpop.f32.mrf.mxu1  ;;  %v494_v0 = vadd.f32 %v493_v30, %v1521_v46  ;;  %v851_v6 = vadd.f32 %v819_v17, %v765_v41 }
 0x15a   :  { %v820_v60 = vadd.f32 %v767_v40, %v766_v43  ;;  %v496_v3 = vadd.f32 %v495_v57, %v1524_v47  ;;  %v1213_v59 = vpack.c.bf16 %v858_v54, %v857_v49  ;;  %v856_v4 = vadd.f32 %v1538_v8, %v780_v56 }
 0x15b   :  { %v689_v15 = vadd.f32 %v688_v35, %v1569_v42  ;;  %v497_v5 = vpop.f32.mrf.mxu0  ;;  %v1311_v26 = vpop.f32.mrf.mxu1  ;;  %v795_v52 = vmax.f32 %v697_v31, 0.0  ;;  %v668_v8 = vadd.f32 %v1638_v44, %v1569_v42  ;;  %v769_v53 = vmax.f32 %v494_v0, 0.0 }
 0x15c   :  { %v852_v7 = vadd.f32 %v820_v60, %v768_v58  ;;  %v770_v45 = vmax.f32 %v496_v3, 0.0  ;;  %v498_v27 = vadd.f32 %v497_v5, %v1521_v46  ;;  %1237 = vst [vmem:[#allocation7 + $0x68] sm:$0xff] %v1213_v59   ;;  %v1208_v2 = vpack.c.bf16 %v856_v4, %v855_v18 }
 0x15d   :  { %v700_v61 = vadd.f32 %v1311_v26, %v1569_v42  ;;  %v499_v1 = vpop.f32.mrf.mxu0  ;;  %v691_v11 = vpop.f32.mrf.mxu1  ;;  %v789_v46 = vmax.f32 %v689_v15, 0.0  ;;  %v861_v62 = vadd.f32 %v1576_v51, %v795_v52  ;;  %v774_v44 = vmax.f32 %v668_v8, 0.0 }
 0x15e   :  { %v1198_v12 = vpack.c.bf16 %v852_v7, %v851_v6  ;;  %v500_v55 = vadd.f32 %v499_v1, %v1524_v47  ;;  %1236 = vst [vmem:[#allocation7 + $0x60] sm:$0xff] %v1208_v2   ;;  %v692_v22 = vadd.f32 %v691_v11, %v1569_v42  ;;  %v821_v13 = vadd.f32 %v770_v45, %v769_v53 }
 0x15f   :  { %v798_v63 = vmax.f32 %v700_v61, 0.0  ;;  %v772_v19 = vmax.f32 %v498_v27, 0.0  ;;  %v859_v25 = vadd.f32 %v1553_v33, %v789_v46 }
 0x160   :  { %1234 = vst [vmem:[#allocation7 + $0x50] sm:$0xff] %v1198_v12   ;;  %v773_v20 = vmax.f32 %v500_v55, 0.0  ;;  %v792_v21 = vmax.f32 %v692_v22, 0.0  ;;  %v853_v28 = vadd.f32 %v821_v13, %v771_v9 }
 0x161   :  { %v862_v23 = vadd.f32 %v830_v14, %v798_v63 }
 0x162   :  { %v822_v24 = vadd.f32 %v773_v20, %v772_v19  ;;  %v860_v16 = vadd.f32 %v1559_v50, %v792_v21 }
 0x163   :  { %v1223_v47 = vpack.c.bf16 %v862_v23, %v861_v62 }
 0x164   :  { %v854_v42 = vadd.f32 %v822_v24, %v774_v44  ;;  %v1218_v29 = vpack.c.bf16 %v860_v16, %v859_v25 }
 0x165   :  { %1239 = vst [vmem:[#allocation7 + $0x78] sm:$0xff] %v1223_v47  }
 0x166   :  { %v1203_v32 = vpack.c.bf16 %v854_v42, %v853_v28  ;;  %1238 = vst [vmem:[#allocation7 + $0x70] sm:$0xff] %v1218_v29  }
 0x168   :  { %1235 = vst [vmem:[#allocation7 + $0x58] sm:$0xff] %v1203_v32  }
 0x169   :  { %1435 = shalt.err (!%p1432_p0)
}
 0x16a   :  { %1034 = dma.vmem_to_hbm [thread:$0]  %s1029_s26, 2048, %s1692_s3, [#allocation4], %s1451_s15, %s1451_s15, %s1452_s16  }
 0x16b   :  { %1448 = dma.done.wait [#allocation4], 2048  }
 0x16c   :  { %1449 = vsyncadd [#allocation4], 4294965248 }
 0x16d   :  { %1038 = vsyncpa [#allocation3], 1 }
 0x16e   :  { %1039 = vsyncpa [#allocation6], 1 }
 0x16f   :  { %1040 = vsyncpa [#allocation4], 1 }

</bundles_post_ra>
